<compile_context>
chip_gen: v6e
topology: v6e:2x2x1
jax: 0.10.0
libtpu: 0.0.40
codegen_flags: <defaults>
</compile_context>

<pallas_src>
import jax
import jax.numpy as jnp
from jax.experimental import pallas as pl
from jax.experimental.pallas import tpu as pltpu


def _swiglu_kernel(x_ref, wg_ref, wl_ref, bg_ref, bl_ref, beta_ref, o_ref,
                   acc_g_ref, acc_l_ref):
    k = pl.program_id(2)

    @pl.when(k == 0)
    def _():
        # Fold the bias into the accumulator init: epilogue stays minimal and
        # no extra VPU adds on the last K step.
        acc_g_ref[...] = jnp.broadcast_to(bg_ref[...], acc_g_ref.shape)
        acc_l_ref[...] = jnp.broadcast_to(bl_ref[...], acc_l_ref.shape)

    x = x_ref[...]                                               # (tm, tk)
    acc_g_ref[...] += jnp.dot(x, wg_ref[...],
                              preferred_element_type=jnp.float32)
    acc_l_ref[...] += jnp.dot(x, wl_ref[...],
                              preferred_element_type=jnp.float32)

    @pl.when(k == pl.num_programs(2) - 1)
    def _():
        beta = beta_ref[0]                                       # SMEM scalar
        g = acc_g_ref[...]                                       # f32 (bias included)
        lin = acc_l_ref[...]                                     # f32 (bias included)
        swish = g * jax.nn.sigmoid(beta * g)                     # VPU + EUP, f32
        o_ref[...] = (swish * lin).astype(o_ref.dtype)


def _round_up(n, m):
    return ((n + m - 1) // m) * m


def _maybe_pad(arr, shape, dtype):
    """Zero-pad `arr` into `shape` / cast to `dtype`; no-op copy if aligned."""
    arr = arr.astype(dtype)
    if tuple(arr.shape) == tuple(shape):
        return arr
    out = jnp.zeros(shape, dtype)
    return out.at[tuple(slice(0, s) for s in arr.shape)].set(arr)


def swiglu(x, w_gate, b_gate, w_lin, b_lin, beta, *,
           tm=256, tn=512, tk=512,
           compute_dtype=None,
           vmem_limit_bytes=48 * 1024 * 1024):
    """SwiGLU forward.

    x: [M, D]; w_*: [D, D] stored input-major ([in, out]); b_*: [D]; beta scalar.
    compute_dtype: dtype of the MXU operands (e.g. jnp.bfloat16 on v6e/v7x);
                   accumulation and activation math stay f32.
    """
    M, D = x.shape
    out_dtype = x.dtype
    op_dtype = compute_dtype if compute_dtype is not None else x.dtype

    # Tile sizes: rows multiple of 8 (sublane), cols multiple of 128 (lane),
    # clamped to the padded problem size.
    tm_eff = min(tm, _round_up(M, 8))
    tn_eff = min(tn, _round_up(D, 128))
    tk_eff = min(tk, _round_up(D, 128))

    m_pad = _round_up(M, tm_eff)
    n_pad = _round_up(D, tn_eff)
    k_pad = _round_up(D, tk_eff)

    # Zero padding keeps the math exact (extra K rows/cols contribute 0;
    # extra M rows / N cols are sliced off below). Skipped entirely when the
    # shapes are already aligned.
    x_p = _maybe_pad(x, (m_pad, k_pad), op_dtype)
    wg_p = _maybe_pad(w_gate, (k_pad, n_pad), op_dtype)
    wl_p = _maybe_pad(w_lin, (k_pad, n_pad), op_dtype)
    bg_p = _maybe_pad(b_gate.reshape(1, D), (1, n_pad), jnp.float32)
    bl_p = _maybe_pad(b_lin.reshape(1, D), (1, n_pad), jnp.float32)
    beta_arr = jnp.asarray(beta, jnp.float32).reshape(1)

    grid = (m_pad // tm_eff, n_pad // tn_eff, k_pad // tk_eff)

    itemsize = jnp.dtype(op_dtype).itemsize
    cost = pl.CostEstimate(
        flops=4 * m_pad * n_pad * k_pad + 4 * m_pad * n_pad,  # 2 matmuls + eltwise
        transcendentals=m_pad * n_pad,                        # sigmoid
        bytes_accessed=(x_p.size * itemsize
                        + wg_p.size * itemsize + wl_p.size * itemsize
                        + (bg_p.size + bl_p.size) * 4
                        + m_pad * n_pad * jnp.dtype(out_dtype).itemsize),
    )

    out = pl.pallas_call(
        _swiglu_kernel,
        out_shape=jax.ShapeDtypeStruct((m_pad, n_pad), out_dtype),
        grid_spec=pltpu.PrefetchScalarGridSpec(
            num_scalar_prefetch=0,
            grid=grid,
            in_specs=[
                pl.BlockSpec((tm_eff, tk_eff), lambda i, j, k: (i, k)),   # x tile
                pl.BlockSpec((tk_eff, tn_eff), lambda i, j, k: (k, j)),   # W_gate slab
                pl.BlockSpec((tk_eff, tn_eff), lambda i, j, k: (k, j)),   # W_lin slab
                pl.BlockSpec((1, tn_eff), lambda i, j, k: (0, j)),        # b_gate
                pl.BlockSpec((1, tn_eff), lambda i, j, k: (0, j)),        # b_lin
                pl.BlockSpec(memory_space=pltpu.MemorySpace.SMEM),        # beta scalar
            ],
            out_specs=pl.BlockSpec((tm_eff, tn_eff), lambda i, j, k: (i, j)),
            scratch_shapes=[
                pltpu.VMEM((tm_eff, tn_eff), jnp.float32),   # gate accumulator
                pltpu.VMEM((tm_eff, tn_eff), jnp.float32),   # linear accumulator
            ],
        ),
        compiler_params=pltpu.CompilerParams(
            dimension_semantics=("parallel", "parallel", "arbitrary"),
            vmem_limit_bytes=vmem_limit_bytes,
        ),
        cost_estimate=cost,
    )(x_p, wg_p, wl_p, bg_p, bl_p, beta_arr)

    if (m_pad, n_pad) != (M, D):
        out = out[:M, :D]
    return out


def swiglu_ref(x, w_gate, b_gate, w_lin, b_lin, beta):
    g = x @ w_gate + b_gate
    lin = x @ w_lin + b_lin
    return g * jax.nn.sigmoid(beta * g) * lin


if __name__ == "__main__":
    key = jax.random.PRNGKey(0)
    batch, seq, size = 2, 8, 32           # SwiGLU(size=32)
    k1, k2, k3, k4, k5 = jax.random.split(key, 5)

    x = jax.random.normal(k1, (batch, seq, size), jnp.float32)

    # Deterministic synthetic parameters (PyTorch Linear: weight [out, in]).
    # Stored pre-transposed as [in, out] for the kernel.
    bound = 1.0 / jnp.sqrt(size)
    w_gate = jax.random.uniform(k2, (size, size), jnp.float32, -bound, bound)
    b_gate = jax.random.uniform(k3, (size,), jnp.float32, -bound, bound)
    w_lin = jax.random.uniform(k4, (size, size), jnp.float32, -bound, bound)
    b_lin = jax.random.uniform(k5, (size,), jnp.float32, -bound, bound)
    beta = jnp.float32(1.0)               # nn.Parameter(torch.ones(1))

    x2d = x.reshape(batch * seq, size)    # flatten leading dims, like nn.Linear
    ref = swiglu_ref(x2d, w_gate, b_gate, w_lin, b_lin, beta)

    # f32 MXU operands: tight tolerance.
    out_f32 = swiglu(x2d, w_gate, b_gate, w_lin, b_lin, beta)
    out_f32 = jax.block_until_ready(out_f32)
    assert jnp.allclose(out_f32, ref, atol=1e-5, rtol=1e-5), "f32 mismatch vs reference"

    # bf16 MXU operands (v6e/v7x fast path), f32 accumulation: looser tolerance.
    out_bf16 = swiglu(x2d, w_gate, b_gate, w_lin, b_lin, beta,
                      compute_dtype=jnp.bfloat16)
    out_bf16 = jax.block_until_ready(out_bf16)
    assert jnp.allclose(out_bf16, ref, atol=2e-2, rtol=2e-2), "bf16 mismatch vs reference"

    print("KERNEL_OK")
</pallas_src>

<mosaic_0001>
module attributes {stable_mosaic.version = 11 : i64} {
  func.func @_swiglu_kernel(%arg0: i32, %arg1: i32, %arg2: i32, %arg3: memref<16x128xf32, #tpu.memory_space<vmem>>, %arg4: memref<128x128xf32, #tpu.memory_space<vmem>>, %arg5: memref<128x128xf32, #tpu.memory_space<vmem>>, %arg6: memref<1x128xf32, #tpu.memory_space<vmem>>, %arg7: memref<1x128xf32, #tpu.memory_space<vmem>>, %arg8: memref<1xf32, #tpu.memory_space<smem>>, %arg9: memref<16x128xf32, #tpu.memory_space<vmem>>, %arg10: memref<16x128xf32, #tpu.memory_space<vmem>>, %arg11: memref<16x128xf32, #tpu.memory_space<vmem>>) attributes {dimension_semantics = [#tpu.dimension_semantics<parallel>, #tpu.dimension_semantics<parallel>, #tpu.dimension_semantics<arbitrary>], iteration_bounds = array<i64: 1, 1, 1>, scalar_prefetch = 0 : i64, scratch_operands = 2 : i64, tpu.core_type = #tpu.core_type<tc>, window_params = [{transform_indices = @transform_0, window_bounds = array<i64: 16, 128>}, {transform_indices = @transform_1, window_bounds = array<i64: 128, 128>}, {transform_indices = @transform_2, window_bounds = array<i64: 128, 128>}, {transform_indices = @transform_3, window_bounds = array<i64: 1, 128>}, {transform_indices = @transform_4, window_bounds = array<i64: 1, 128>}, {transform_indices = @transform_5, window_bounds = array<i64: 1>}, {transform_indices = @transform_6, window_bounds = array<i64: 16, 128>}]} {
    %c0_i32 = arith.constant 0 : i32
    %0 = arith.cmpi eq, %arg2, %c0_i32 : i32
    %1 = arith.extui %0 : i1 to i32
    %c0_i32_0 = arith.constant 0 : i32
    %2 = arith.cmpi ne, %1, %c0_i32_0 : i32
    scf.if %2 {
      %c0_17 = arith.constant 0 : index
      %c0_18 = arith.constant 0 : index
      %17 = vector.load %arg6[%c0_17, %c0_18] : memref<1x128xf32, #tpu.memory_space<vmem>>, vector<1x128xf32>
      %18 = vector.shape_cast %17 : vector<1x128xf32> to vector<1x128xf32>
      %19 = vector.broadcast %18 : vector<1x128xf32> to vector<16x128xf32>
      %c0_19 = arith.constant 0 : index
      %c0_20 = arith.constant 0 : index
      %20 = vector.load %arg10[%c0_19, %c0_20] : memref<16x128xf32, #tpu.memory_space<vmem>>, vector<16x128xf32>
      tpu.vector_store %arg10[%c0_19, %c0_20], %19 {strides = array<i32>} : memref<16x128xf32, #tpu.memory_space<vmem>>, vector<16x128xf32>,
      %c0_21 = arith.constant 0 : index
      %c0_22 = arith.constant 0 : index
      %21 = vector.load %arg7[%c0_21, %c0_22] : memref<1x128xf32, #tpu.memory_space<vmem>>, vector<1x128xf32>
      %22 = vector.shape_cast %21 : vector<1x128xf32> to vector<1x128xf32>
      %23 = vector.broadcast %22 : vector<1x128xf32> to vector<16x128xf32>
      %c0_23 = arith.constant 0 : index
      %c0_24 = arith.constant 0 : index
      %24 = vector.load %arg11[%c0_23, %c0_24] : memref<16x128xf32, #tpu.memory_space<vmem>>, vector<16x128xf32>
      tpu.vector_store %arg11[%c0_23, %c0_24], %23 {strides = array<i32>} : memref<16x128xf32, #tpu.memory_space<vmem>>, vector<16x128xf32>,
    } else {
    }
    %c0 = arith.constant 0 : index
    %c0_1 = arith.constant 0 : index
    %3 = vector.load %arg3[%c0, %c0_1] : memref<16x128xf32, #tpu.memory_space<vmem>>, vector<16x128xf32>
    %c0_2 = arith.constant 0 : index
    %c0_3 = arith.constant 0 : index
    %4 = vector.load %arg10[%c0_2, %c0_3] : memref<16x128xf32, #tpu.memory_space<vmem>>, vector<16x128xf32>
    %c0_4 = arith.constant 0 : index
    %c0_5 = arith.constant 0 : index
    %5 = vector.load %arg4[%c0_4, %c0_5] : memref<128x128xf32, #tpu.memory_space<vmem>>, vector<128x128xf32>
    %cst = arith.constant dense<0.000000e+00> : vector<16x128xf32>
    %6 = tpu.matmul %3, %5, %cst {dimension_numbers = #tpu.dot_dimension_numbers<[1], [0], [0], [1], [0, 0, 1, 1], [], []>} : vector<16x128xf32>, vector<128x128xf32>, vector<16x128xf32> -> vector<16x128xf32>
    %7 = arith.addf %4, %6 : vector<16x128xf32>
    %c0_6 = arith.constant 0 : index
    %c0_7 = arith.constant 0 : index
    %8 = vector.load %arg10[%c0_6, %c0_7] : memref<16x128xf32, #tpu.memory_space<vmem>>, vector<16x128xf32>
    tpu.vector_store %arg10[%c0_6, %c0_7], %7 {strides = array<i32>} : memref<16x128xf32, #tpu.memory_space<vmem>>, vector<16x128xf32>,
    %c0_8 = arith.constant 0 : index
    %c0_9 = arith.constant 0 : index
    %9 = vector.load %arg11[%c0_8, %c0_9] : memref<16x128xf32, #tpu.memory_space<vmem>>, vector<16x128xf32>
    %c0_10 = arith.constant 0 : index
    %c0_11 = arith.constant 0 : index
    %10 = vector.load %arg5[%c0_10, %c0_11] : memref<128x128xf32, #tpu.memory_space<vmem>>, vector<128x128xf32>
    %cst_12 = arith.constant dense<0.000000e+00> : vector<16x128xf32>
    %11 = tpu.matmul %3, %10, %cst_12 {dimension_numbers = #tpu.dot_dimension_numbers<[1], [0], [0], [1], [0, 0, 1, 1], [], []>} : vector<16x128xf32>, vector<128x128xf32>, vector<16x128xf32> -> vector<16x128xf32>
    %12 = arith.addf %9, %11 : vector<16x128xf32>
    %c0_13 = arith.constant 0 : index
    %c0_14 = arith.constant 0 : index
    %13 = vector.load %arg11[%c0_13, %c0_14] : memref<16x128xf32, #tpu.memory_space<vmem>>, vector<16x128xf32>
    tpu.vector_store %arg11[%c0_13, %c0_14], %12 {strides = array<i32>} : memref<16x128xf32, #tpu.memory_space<vmem>>, vector<16x128xf32>,
    %c0_i32_15 = arith.constant 0 : i32
    %14 = arith.cmpi eq, %arg2, %c0_i32_15 : i32
    %15 = arith.extui %14 : i1 to i32
    %c0_i32_16 = arith.constant 0 : i32
    %16 = arith.cmpi ne, %15, %c0_i32_16 : i32
    scf.if %16 {
      %c0_17 = arith.constant 0 : index
      %17 = memref.load %arg8[%c0_17] : memref<1xf32, #tpu.memory_space<smem>>
      %c0_18 = arith.constant 0 : index
      %c0_19 = arith.constant 0 : index
      %18 = vector.load %arg10[%c0_18, %c0_19] : memref<16x128xf32, #tpu.memory_space<vmem>>, vector<16x128xf32>
      %c0_20 = arith.constant 0 : index
      %c0_21 = arith.constant 0 : index
      %19 = vector.load %arg11[%c0_20, %c0_21] : memref<16x128xf32, #tpu.memory_space<vmem>>, vector<16x128xf32>
      %20 = vector.broadcast %17 : f32 to vector<16x128xf32>
      %21 = arith.mulf %20, %18 : vector<16x128xf32>
      %22 = arith.negf %21 : vector<16x128xf32>
      %23 = math.exp %22 : vector<16x128xf32>
      %cst_22 = arith.constant 1.000000e+00 : f32
      %24 = vector.broadcast %cst_22 : f32 to vector<16x128xf32>
      %25 = arith.addf %24, %23 : vector<16x128xf32>
      %26 = arith.divf %24, %25 : vector<16x128xf32>
      %27 = arith.mulf %18, %26 : vector<16x128xf32>
      %28 = arith.mulf %27, %19 : vector<16x128xf32>
      %c0_23 = arith.constant 0 : index
      %c0_24 = arith.constant 0 : index
      %29 = vector.load %arg9[%c0_23, %c0_24] : memref<16x128xf32, #tpu.memory_space<vmem>>, vector<16x128xf32>
      tpu.vector_store %arg9[%c0_23, %c0_24], %28 {strides = array<i32>} : memref<16x128xf32, #tpu.memory_space<vmem>>, vector<16x128xf32>,
    } else {
    }
    return
  }
  func.func @transform_0(%arg0: i32, %arg1: i32, %arg2: i32) -> (i32, i32) {
    %c0_i32 = arith.constant 0 : i32
    return %arg0, %arg2 : i32, i32
  }
  func.func @transform_1(%arg0: i32, %arg1: i32, %arg2: i32) -> (i32, i32) {
    %c0_i32 = arith.constant 0 : i32
    return %arg2, %arg1 : i32, i32
  }
  func.func @transform_2(%arg0: i32, %arg1: i32, %arg2: i32) -> (i32, i32) {
    %c0_i32 = arith.constant 0 : i32
    return %arg2, %arg1 : i32, i32
  }
  func.func @transform_3(%arg0: i32, %arg1: i32, %arg2: i32) -> (i32, i32) {
    %c0_i32 = arith.constant 0 : i32
    %c0_i32_0 = arith.constant 0 : i32
    return %c0_i32, %arg1 : i32, i32
  }
  func.func @transform_4(%arg0: i32, %arg1: i32, %arg2: i32) -> (i32, i32) {
    %c0_i32 = arith.constant 0 : i32
    %c0_i32_0 = arith.constant 0 : i32
    return %c0_i32, %arg1 : i32, i32
  }
  func.func @transform_5(%arg0: i32, %arg1: i32, %arg2: i32) -> i32 {
    %c0_i32 = arith.constant 0 : i32
    %c0_i32_0 = arith.constant 0 : i32
    return %c0_i32 : i32
  }
  func.func @transform_6(%arg0: i32, %arg1: i32, %arg2: i32) -> (i32, i32) {
    %c0_i32 = arith.constant 0 : i32
    return %arg0, %arg1 : i32, i32
  }
}

</mosaic_0001>

<bundles_post_ra>
// kernel: tpu_custom_call.1
= control target key start
LH: loop header
LB: loop body
LE: loop exit
PB: predicated region body
PF: predicated region fallthrough
CT: control target
= control target key end

     0   :  { %12 = vsyncpa [#allocation6], 0  ;;  %s619_s0 = inlined_call_operand.hbm [shape: f32[16,128], index: 0, kind: input, shape index: {}]   ;;  %s620_s1 = inlined_call_operand.hbm [shape: f32[128,128], index: 1, kind: input, shape index: {}]   ;;  %s621_s2 = inlined_call_operand.hbm [shape: f32[128,128], index: 2, kind: input, shape index: {}]   ;;  %s622_s3 = inlined_call_operand.vmem [shape: f32[1,128], index: 3, kind: input, shape index: {}]   ;;  %s623_s4 = inlined_call_operand.vmem [shape: f32[1,128], index: 4, kind: input, shape index: {}]   ;;  %s624_s5 = inlined_call_operand.<no memory space> [shape: f32[1], index: 5, kind: input, shape index: {}]   ;;  %s625_s6 = inlined_call_operand.hbm [shape: f32[16,128], index: 6, kind: output, shape index: {}]  }
   0x1   :  { %13 = vsyncpa [#allocation9], 0 }
   0x2   :  { %14 = vsyncpa [#allocation7], 0  ;;  %s541_s21 = smov [#allocation8]   ;;  %s542_s23 = smov [#allocation5]  }
   0x3   :  { %s32_s22 = sshll.u32 %s541_s21, 4  ;;  %s20_s24 = sshll.u32 %s542_s23, 4  ;;  %s33_s22 = int_to_ptr.vmem [resolvable:$true] %s32_s22  ;;  %s21_s24 = int_to_ptr.vmem [resolvable:$true] %s20_s24 }
   0x4   :  { %s463_s25 = scalar_lea.vmem %s33_s22, 2048  ;;  %p468_p1 = scmp.lt.s32.totalorder %s33_s22, %s33_s22 }
   0x5   :  { %p464_p0 = scmp.ne.s32.totalorder %s33_s22, %s463_s25  ;;  %p469_p2 = scmp.lt.s32.totalorder %s463_s25, %s463_s25 }
   0x7   :  { %p470_p3 = por %p469_p2, %p468_p1 }
   0x9   :  { %p471_p4 = pnand %p470_p3, %p464_p0 }
   0xb   :  { %474 = shalt.err (!%p471_p4)
}
   0xc   :  { %s543_s26 = smov 128   ;;  %s544_s27 = smov 8  }
   0xd   :  { %38 = dma.hbm_to_vmem [thread:$0]  %s620_s1, 2048, %s33_s22, [#allocation9], %s543_s26, %s543_s26, %s544_s27  }
   0xe   :  { %s483_s30 = scalar_lea.vmem %s21_s24, 256  ;;  %p488_p6 = scmp.lt.s32.totalorder %s21_s24, %s21_s24 }
   0xf   :  { %p484_p5 = scmp.ne.s32.totalorder %s21_s24, %s483_s30  ;;  %p489_p7 = scmp.lt.s32.totalorder %s483_s30, %s483_s30 }
  0x11   :  { %p490_p8 = por %p489_p7, %p488_p6 }
  0x13   :  { %p491_p9 = pnand %p490_p8, %p484_p5 }
  0x15   :  { %494 = shalt.err (!%p491_p9)
}
  0x16   :  { %26 = dma.hbm_to_vmem [thread:$0]  %s619_s0, 256, %s21_s24, [#allocation6], %s543_s26, %s543_s26, %s544_s27  }
  0x17   :  { %s545_s9 = smov [#allocation10]  }
  0x18   :  { %s44_s10 = sshll.u32 %s545_s9, 4  ;;  %s45_s10 = int_to_ptr.vmem [resolvable:$true] %s44_s10 }
  0x19   :  { %s503_s11 = scalar_lea.vmem %s45_s10, 2048  ;;  %p508_p11 = scmp.lt.s32.totalorder %s45_s10, %s45_s10 }
  0x1a   :  { %p504_p10 = scmp.ne.s32.totalorder %s45_s10, %s503_s11  ;;  %p509_p12 = scmp.lt.s32.totalorder %s503_s11, %s503_s11 }
  0x1c   :  { %p510_p13 = por %p509_p12, %p508_p11 }
  0x1e   :  { %p511_p0 = pnand %p510_p13, %p504_p10 }
  0x20   :  { %514 = shalt.err (!%p511_p0)
}
  0x21   :  { %50 = dma.hbm_to_vmem [thread:$0]  %s621_s2, 2048, %s45_s10, [#allocation9], %s543_s26, %s543_s26, %s544_s27  }
  0x22   :  { %535 = dma.done.wait [#allocation6], 256  }
  0x23   :  { %536 = vsyncadd [#allocation6], 4294967040 }
  0x24   :  { %537 = dma.done.wait [#allocation9], 4096  }
  0x25   :  { %538 = vsyncadd [#allocation9], 4294963200  ;;  %v107_v0 = vld [vmem:[#allocation8 + $0x78] sm:$0xff]  ;;  %v106_v1 = vld [vmem:[#allocation8 + $0x70] sm:$0xff]  ;;  %v292_v36 = vstv %s624_s5  ;;  %s546_s5 = smov [#allocation11]  }
  0x26   :  { %371 = vmatprep.subr.mxu0 %v107_v0  ;;  %v105_v2 = vld [vmem:[#allocation8 + $0x68] sm:$0xff]  ;;  %v104_v3 = vld [vmem:[#allocation8 + $0x60] sm:$0xff]  ;;  %v600_v4 = vld [vmem:[#allocation5] sm:$0xff]  ;;  %s318_s16 = sshll.u32 %s546_s5, 4  ;;  %s319_s16 = int_to_ptr.vmem [resolvable:$true] %s318_s16 }
  0x27   :  { %372 = vmatpush3.msra.mxu0 %v107_v0  ;;  %v103_v5 = vld [vmem:[#allocation8 + $0x58] sm:$0xff]  ;;  %403 = vmatprep.mubr.f32.mxu0 %v600_v4  ;;  %v203_v7 = vld [vmem:[#allocation10 + $0x70] sm:$0xff]  ;;  %v202_v9 = vld [vmem:[#allocation10 + $0x68] sm:$0xff]  ;;  %s515_s17 = scalar_lea.vmem %s319_s16, 256  ;;  %p520_p2 = scmp.lt.s32.totalorder %s319_s16, %s319_s16 }
  0x28   :  { %373 = vmatprep.subr.mxu0 %v106_v1  ;;  %v204_v6 = vld [vmem:[#allocation10 + $0x78] sm:$0xff]  ;;  %v102_v8 = vld [vmem:[#allocation8 + $0x50] sm:$0xff]  ;;  %v101_v10 = vld [vmem:[#allocation8 + $0x48] sm:$0xff]  ;;  %438 = vmatprep.mubr.f32.mxu1 %v600_v4  ;;  %p516_p1 = scmp.ne.s32.totalorder %s319_s16, %s515_s17  ;;  %p521_p3 = scmp.lt.s32.totalorder %s515_s17, %s515_s17 }
  0x29   :  { %374 = vmatpush3.msra.mxu0 %v106_v1  ;;  %406 = vmatprep.subr.mxu1 %v204_v6  ;;  %v201_v11 = vld [vmem:[#allocation10 + $0x60] sm:$0xff]  ;;  %v200_v13 = vld [vmem:[#allocation10 + $0x58] sm:$0xff]  ;;  %v199_v15 = vld [vmem:[#allocation10 + $0x50] sm:$0xff] }
  0x2a   :  { %375 = vmatprep.subr.mxu0 %v105_v2  ;;  %407 = vmatpush3.msra.mxu1 %v204_v6  ;;  %v100_v12 = vld [vmem:[#allocation8 + $0x40] sm:$0xff]  ;;  %v99_v14 = vld [vmem:[#allocation8 + $0x38] sm:$0xff]  ;;  %v98_v16 = vld [vmem:[#allocation8 + $0x30] sm:$0xff]  ;;  %p522_p4 = por %p521_p3, %p520_p2 }
  0x2b   :  { %376 = vmatpush3.msra.mxu0 %v105_v2  ;;  %408 = vmatprep.subr.mxu1 %v203_v7  ;;  %v198_v17 = vld [vmem:[#allocation10 + $0x48] sm:$0xff]  ;;  %v197_v19 = vld [vmem:[#allocation10 + $0x40] sm:$0xff]  ;;  %v196_v21 = vld [vmem:[#allocation10 + $0x38] sm:$0xff] }
  0x2c   :  { %377 = vmatprep.subr.mxu0 %v104_v3  ;;  %409 = vmatpush3.msra.mxu1 %v203_v7  ;;  %v97_v18 = vld [vmem:[#allocation8 + $0x28] sm:$0xff]  ;;  %v96_v20 = vld [vmem:[#allocation8 + $0x20] sm:$0xff]  ;;  %v95_v22 = vld [vmem:[#allocation8 + $0x18] sm:$0xff]  ;;  %p523_p5 = pnand %p522_p4, %p516_p1 }
  0x2d   :  { %378 = vmatpush3.msra.mxu0 %v104_v3  ;;  %410 = vmatprep.subr.mxu1 %v202_v9  ;;  %v195_v23 = vld [vmem:[#allocation10 + $0x30] sm:$0xff]  ;;  %v194_v25 = vld [vmem:[#allocation10 + $0x28] sm:$0xff]  ;;  %v193_v27 = vld [vmem:[#allocation10 + $0x20] sm:$0xff] }
  0x2e   :  { %379 = vmatprep.subr.mxu0 %v103_v5  ;;  %411 = vmatpush3.msra.mxu1 %v202_v9  ;;  %v94_v24 = vld [vmem:[#allocation8 + $0x10] sm:$0xff]  ;;  %v93_v26 = vld [vmem:[#allocation8 + $0x8] sm:$0xff]  ;;  %v92_v28 = vld [vmem:[#allocation8] sm:$0xff] }
  0x2f   :  { %380 = vmatpush3.msra.mxu0 %v103_v5  ;;  %412 = vmatprep.subr.mxu1 %v201_v11  ;;  %v192_v29 = vld [vmem:[#allocation10 + $0x18] sm:$0xff]  ;;  %v191_v31 = vld [vmem:[#allocation10 + $0x10] sm:$0xff]  ;;  %v190_v32 = vld [vmem:[#allocation10 + $0x8] sm:$0xff] }
  0x30   :  { %381 = vmatprep.subr.mxu0 %v102_v8  ;;  %413 = vmatpush3.msra.mxu1 %v201_v11  ;;  %v89_v30 = vld [vmem:[#allocation5 + $0x8] sm:$0xff]  ;;  %v189_v33 = vld [vmem:[#allocation10] sm:$0xff]  ;;  %v331_v34 = vld [vmem:[%s622_s3] ss:$0 sm:$0xff] }
  0x31   :  { %382 = vmatpush3.msra.mxu0 %v102_v8  ;;  %414 = vmatprep.subr.mxu1 %v200_v13  ;;  %v332_v48 = vld [vmem:[%s623_s4] ss:$0 sm:$0xff] }
  0x32   :  { %383 = vmatprep.subr.mxu0 %v101_v10  ;;  %415 = vmatpush3.msra.mxu1 %v200_v13 }
  0x33   :  { %384 = vmatpush3.msra.mxu0 %v101_v10  ;;  %416 = vmatprep.subr.mxu1 %v199_v15 }
  0x34   :  { %385 = vmatprep.subr.mxu0 %v100_v12  ;;  %417 = vmatpush3.msra.mxu1 %v199_v15 }
  0x35   :  { %386 = vmatpush3.msra.mxu0 %v100_v12  ;;  %418 = vmatprep.subr.mxu1 %v198_v17 }
  0x36   :  { %387 = vmatprep.subr.mxu0 %v99_v14  ;;  %419 = vmatpush3.msra.mxu1 %v198_v17 }
  0x37   :  { %388 = vmatpush3.msra.mxu0 %v99_v14  ;;  %420 = vmatprep.subr.mxu1 %v197_v19 }
  0x38   :  { %389 = vmatprep.subr.mxu0 %v98_v16  ;;  %421 = vmatpush3.msra.mxu1 %v197_v19 }
  0x39   :  { %390 = vmatpush3.msra.mxu0 %v98_v16  ;;  %422 = vmatprep.subr.mxu1 %v196_v21 }
  0x3a   :  { %391 = vmatprep.subr.mxu0 %v97_v18  ;;  %423 = vmatpush3.msra.mxu1 %v196_v21 }
  0x3b   :  { %392 = vmatpush3.msra.mxu0 %v97_v18  ;;  %424 = vmatprep.subr.mxu1 %v195_v23 }
  0x3c   :  { %393 = vmatprep.subr.mxu0 %v96_v20  ;;  %425 = vmatpush3.msra.mxu1 %v195_v23 }
  0x3d   :  { %394 = vmatpush3.msra.mxu0 %v96_v20  ;;  %426 = vmatprep.subr.mxu1 %v194_v25 }
  0x3e   :  { %395 = vmatprep.subr.mxu0 %v95_v22  ;;  %427 = vmatpush3.msra.mxu1 %v194_v25 }
  0x3f   :  { %396 = vmatpush3.msra.mxu0 %v95_v22  ;;  %428 = vmatprep.subr.mxu1 %v193_v27 }
  0x40   :  { %397 = vmatprep.subr.mxu0 %v94_v24  ;;  %429 = vmatpush3.msra.mxu1 %v193_v27 }
  0x41   :  { %398 = vmatpush3.msra.mxu0 %v94_v24  ;;  %430 = vmatprep.subr.mxu1 %v192_v29 }
  0x42   :  { %399 = vmatprep.subr.mxu0 %v93_v26  ;;  %431 = vmatpush3.msra.mxu1 %v192_v29 }
  0x43   :  { %400 = vmatpush3.msra.mxu0 %v93_v26  ;;  %432 = vmatprep.subr.mxu1 %v191_v31 }
  0x44   :  { %401 = vmatprep.subr.mxu0 %v92_v28  ;;  %433 = vmatpush3.msra.mxu1 %v191_v31 }
  0x45   :  { %402 = vmatpush3.msra.mxu0 %v92_v28  ;;  %434 = vmatprep.subr.mxu1 %v190_v32 }
  0x46   :  { %404 = vmatmul.mubr.f32.vlgmr.msra.gmra.mxu0 %v89_v30  ;;  %435 = vmatpush3.msra.mxu1 %v190_v32 }
  0x47   :  { %436 = vmatprep.subr.mxu1 %v189_v33 }
  0x48   :  { %437 = vmatpush3.msra.mxu1 %v189_v33 }
  0x49   :  { %439 = vmatmul.mubr.f32.vlgmr.msra.gmra.mxu1 %v89_v30 }
 0x106   :  { %v405_v35 = vpop.f32.mrf.mxu0 }
 0x107   :  { %v184_v37 = vadd.f32 %v405_v35, %v331_v34 }
 0x108   :  { %v174_v38 = vpop.f32.mrf.mxu0 }
 0x109   :  { %v294_v39 = vmul.f32 %v292_v36, %v184_v37  ;;  %v183_v40 = vadd.f32 %v331_v34, %v174_v38  ;;  %v440_v49 = vpop.f32.mrf.mxu1 }
 0x10a   :  { %v281_v50 = vadd.f32 %v440_v49, %v332_v48 }
 0x10b   :  { %v334_v41 = vmul.f32 -1.442695, %v294_v39  ;;  %v293_v42 = vmul.f32 %v292_v36, %v183_v40  ;;  %v271_v52 = vpop.f32.mrf.mxu1 }
 0x10c   :  { %v280_v57 = vadd.f32 %v332_v48, %v271_v52 }
 0x10d   :  { %447 = vpow2.f32 %v334_v41  ;;  %v333_v43 = vmul.f32 -1.442695, %v293_v42 }
 0x10f   :  { %449 = vpow2.f32 %v333_v43 }
 0x11a   :  { %v448_v44 = vpop.eup %447 }
 0x11b   :  { %v302_v45 = vadd.f32 1.0, %v448_v44 }
 0x11c   :  { %v450_v46 = vpop.eup %449 }
 0x11d   :  { %451 = vrcp.f32 %v302_v45  ;;  %v301_v47 = vadd.f32 1.0, %v450_v46 }
 0x11f   :  { %453 = vrcp.f32 %v301_v47 }
 0x12a   :  { %v452_v51 = vpop.eup %451 }
 0x12b   :  { %v308_v53 = vmul.f32 %v452_v51, %v184_v37 }
 0x12c   :  { %v454_v54 = vpop.eup %453 }
 0x12d   :  { %v307_v55 = vmul.f32 %v454_v54, %v183_v40  ;;  %v310_v56 = vmul.f32 %v308_v53, %v281_v50 }
 0x12f   :  { %312 = vst [vmem:[#allocation11 + $0x8] sm:$0xff] %v310_v56  ;;  %v309_v58 = vmul.f32 %v307_v55, %v280_v57 }
 0x131   :  { %311 = vst [vmem:[#allocation11] sm:$0xff] %v309_v58 }
 0x132   :  { %526 = shalt.err (!%p523_p5)
}
 0x133   :  { %324 = dma.vmem_to_hbm [thread:$0]  %s319_s16, 256, %s625_s6, [#allocation7], %s543_s26, %s543_s26, %s544_s27  }
 0x134   :  { %539 = dma.done.wait [#allocation7], 256  }
 0x135   :  { %540 = vsyncadd [#allocation7], 4294967040 }
 0x136   :  { %328 = vsyncpa [#allocation6], 1 }
 0x137   :  { %329 = vsyncpa [#allocation9], 1 }
 0x138   :  { %330 = vsyncpa [#allocation7], 1 }

</bundles_post_ra>
